<compile_context>
chip_gen: v7x
topology: tpu7x:2x2x1
jax: 0.10.0
libtpu: 0.0.40
codegen_flags: <defaults>
</compile_context>

<pallas_src>
import jax
import jax.numpy as jnp
from jax.experimental import pallas as pl
from jax.experimental.pallas import tpu as pltpu

# ---- module hyperparameters (hp.*) ----
TOKEN_NUM = 8                       # hp.token_num
E         = 32                      # hp.E
NUM_HEADS = 4                       # hp.num_heads
D_Q       = E // 2                  # query dim (no speaker embedding)
D_K       = E // NUM_HEADS          # key dim
SPLIT     = E // NUM_HEADS          # per-head output size
HT        = NUM_HEADS * TOKEN_NUM   # fused heads*tokens score width (= 32)
PACK      = 128 // E                # batch rows packed per lane-dense super-row (= 4)

_TINY = float(jnp.finfo(jnp.float32).tiny)


def _round_up(x, m):
    return (x + m - 1) // m * m


def _stl_kernel(x_ref, ws_ref, comb_ref, o_ref):
    """One grid step == TILE_N batch rows, packed PACK-per-super-row.

    x_ref    : (TILE_N//PACK, PACK*D_Q)    packed inputs (64 lanes, bf16/f32)
    ws_ref   : (PACK*D_Q, PACK*HT)         block-diag(Wq @ Khat), 1/sqrt(d_k) folded in
    comb_ref : (PACK*HT, 2*PACK*E)         [ block-diag Vhat | block-diag ones(seg) ]
    o_ref    : (TILE_N//PACK, PACK*E)      packed outputs (row-major == (TILE_N, E)), f32
    """
    x = x_ref[...]
    # Scaled attention scores for all heads of all packed rows: (rows, 128), f32 acc.
    s = jnp.dot(x, ws_ref[...], preferred_element_type=jnp.float32)
    # Softmax is shift-invariant within each 8-lane head segment, so subtracting
    # the per-super-row max is exact and keeps exp() in range.
    # NOTE: if one packed batch row's scores exceed a neighbour's by > ~88, the
    # low-score row's exp underflows to 0 and that row is silently zeroed (safe
    # for tanh-bounded keys / moderate weights; see wrapper docstring).
    s = s - jnp.max(s, axis=-1, keepdims=True)
    p = jnp.exp(s).astype(comb_ref.dtype)
    # One fused 256-wide MXU matmul produces [per-head numerators | denominators].
    pm = jnp.dot(p, comb_ref[...], preferred_element_type=jnp.float32)
    numer = pm[:, :PACK * E]
    denom = jnp.maximum(pm[:, PACK * E:], _TINY)      # guards all-underflow rows
    inv = pl.reciprocal(denom, approx=True)           # EUP slot (otherwise idle)
    inv = inv * (2.0 - denom * inv)                   # one Newton step -> ~f32 accurate
    o_ref[...] = (numer * inv).astype(o_ref.dtype)


def _precompute_tables(embed, wq, wk, wv, compute_dtype):
    """Fold every batch-invariant op into two small constant matrices."""
    f32 = jnp.float32
    with jax.default_matmul_precision("highest"):      # tiny one-time constants, keep exact
        keys = jnp.tanh(embed.astype(f32))             # (T, D_K)
        K = keys @ wk.astype(f32)                      # (T, E)
        V = keys @ wv.astype(f32)                      # (T, E)
        scale = 1.0 / (float(D_K) ** 0.5)

        # Per-head block-diagonal forms:
        #   scores = X @ (Wq @ Khat) ; numer = P @ Vhat ; denom = P @ Mseg
        khat = jnp.zeros((E, HT), f32)
        vhat = jnp.zeros((HT, E), f32)
        mseg = jnp.zeros((HT, E), f32)                 # ones(TOKEN_NUM, SPLIT) per head
        for h in range(NUM_HEADS):
            rs, re = h * SPLIT, (h + 1) * SPLIT
            cs, ce = h * TOKEN_NUM, (h + 1) * TOKEN_NUM
            khat = khat.at[rs:re, cs:ce].set(K[:, rs:re].T * scale)
            vhat = vhat.at[cs:ce, rs:re].set(V[:, rs:re])
            mseg = mseg.at[cs:ce, rs:re].set(1.0)
        wscore = wq.astype(f32) @ khat                 # (D_Q, HT); scale folded in

        # Pack PACK batch rows per super-row: block-diagonalize so every kernel
        # tensor is 64 / 128 / 256 lanes wide (fully lane-dense loads and stores).
        eye = jnp.eye(PACK, dtype=f32)
        ws_p = jnp.kron(eye, wscore)                   # (64, 128)
        comb_p = jnp.concatenate(                      # (128, 256) = [Vhat_p | Mseg_p]
            [jnp.kron(eye, vhat), jnp.kron(eye, mseg)], axis=1)
    return ws_p.astype(compute_dtype), comb_p.astype(compute_dtype)


def stl_forward(inputs, embed, wq, wk, wv, *, tile_cap=8192,
                compute_dtype=jnp.bfloat16):
    """inputs [N, E//2] -> style embedding [N, 1, E] (matches torch STL.forward).

    Operands are cast to `compute_dtype` (default bf16, f32 MXU accumulation and
    f32 output).  Pass compute_dtype=jnp.float32 for tighter numerics.
    """
    N = inputs.shape[0]
    ws_p, comb_p = _precompute_tables(embed, wq, wk, wv, compute_dtype)

    # 64 rows == 16 packed sublanes: valid second-minor block multiple for both
    # f32 (8) and bf16 (16) operand tiles.
    align = PACK * 16
    n_units = _round_up(max(N, 1), align)

    # Step-count-first tiling: padding stays below one alignment unit per step.
    steps = max(1, -(-n_units // max(tile_cap, align)))
    if n_units >= 2 * align:
        steps = max(steps, 2)          # let v7x megacore shard across both TCs
    if steps > 2 and steps % 2:
        steps += 1                     # even step count -> balanced TC shares
    tile_n = _round_up(-(-n_units // steps), align)
    n_pad = steps * tile_n

    x = inputs.astype(compute_dtype)
    if n_pad != N:
        x = jnp.pad(x, ((0, n_pad - N), (0, 0)))
    x_packed = x.reshape(n_pad // PACK, PACK * D_Q)    # free row-major repack

    rows_p = tile_n // PACK
    out_packed = pl.pallas_call(
        _stl_kernel,
        out_shape=jax.ShapeDtypeStruct((n_pad // PACK, PACK * E), jnp.float32),
        grid_spec=pltpu.PrefetchScalarGridSpec(
            num_scalar_prefetch=0,
            grid=(steps,),
            in_specs=[
                pl.BlockSpec((rows_p, PACK * D_Q), lambda b: (b, 0)),        # packed X tile
                pl.BlockSpec((PACK * D_Q, PACK * HT), lambda b: (0, 0)),     # Ws (grid-invariant)
                pl.BlockSpec((PACK * HT, 2 * PACK * E), lambda b: (0, 0)),   # [Vhat|Mseg] (grid-invariant)
            ],
            out_specs=pl.BlockSpec((rows_p, PACK * E), lambda b: (b, 0)),
        ),
        compiler_params=pltpu.CompilerParams(
            dimension_semantics=("parallel",)),
    )(x_packed, ws_p, comb_p)

    out = out_packed.reshape(n_pad, E)[:N]
    return out[:, None, :]                              # [N, 1, E]


def stl_reference(inputs, embed, wq, wk, wv):
    """Pure-JAX reference mirroring the PyTorch code (for sanity check)."""
    N = inputs.shape[0]
    query = inputs[:, None, :]                                # [N,1,D_Q]
    keys = jnp.tanh(embed)[None].repeat(N, axis=0)            # [N,T,D_K]
    Q = query @ wq                                            # [N,1,E]
    K = keys @ wk                                             # [N,T,E]
    V = keys @ wv
    Qh = jnp.stack(jnp.split(Q, NUM_HEADS, axis=2), axis=0)   # [H,N,1,S]
    Kh = jnp.stack(jnp.split(K, NUM_HEADS, axis=2), axis=0)   # [H,N,T,S]
    Vh = jnp.stack(jnp.split(V, NUM_HEADS, axis=2), axis=0)
    sc = Qh @ jnp.swapaxes(Kh, 2, 3) / (D_K ** 0.5)           # [H,N,1,T]
    sc = jax.nn.softmax(sc, axis=3)
    out = sc @ Vh                                             # [H,N,1,S]
    out = jnp.concatenate(jnp.split(out, NUM_HEADS, axis=0), axis=3)[0]  # [N,1,E]
    return out


if __name__ == "__main__":
    key = jax.random.PRNGKey(0)
    k_in, k_in2, k_emb, k_q, k_k, k_v = jax.random.split(key, 6)

    # Deterministic parameter init (shapes from STL.__init__ / MultiHeadAttention).
    embed = 0.5 * jax.random.normal(k_emb, (TOKEN_NUM, D_K), dtype=jnp.float32)
    # torch Linear weight is [out, in]; we store [in, out] so the math is x @ W.
    wq = 0.1 * jax.random.normal(k_q, (D_Q, E), dtype=jnp.float32)
    wk = 0.1 * jax.random.normal(k_k, (D_K, E), dtype=jnp.float32)
    wv = 0.1 * jax.random.normal(k_v, (D_K, E), dtype=jnp.float32)

    # Small batch: single grid step, row padding inside one packed tile.
    x1 = jax.random.normal(k_in, (2, D_Q), dtype=jnp.float32)
    out1 = jax.block_until_ready(stl_forward(x1, embed, wq, wk, wv))

    # Larger batch: 2-step "parallel" grid + padded final tile.
    x2 = jax.random.normal(k_in2, (200, D_Q), dtype=jnp.float32)
    out2 = jax.block_until_ready(stl_forward(x2, embed, wq, wk, wv))

    # Reference in full f32 "highest" precision (the context is kept OFF the
    # kernel trace on purpose — see perf notes).
    with jax.default_matmul_precision("highest"):
        ref1 = stl_reference(x1, embed, wq, wk, wv)
        ref2 = stl_reference(x2, embed, wq, wk, wv)

    assert out1.shape == (2, 1, E), out1.shape
    assert out2.shape == (200, 1, E), out2.shape
    # bf16 operands (f32 accumulation / f32 output) -> ~1e-3-level agreement with
    # the full-f32 reference; pass compute_dtype=jnp.float32 for tighter numerics.
    assert jnp.allclose(out1, ref1, atol=3e-3, rtol=3e-3), "mismatch vs reference (N=2)"
    assert jnp.allclose(out2, ref2, atol=3e-3, rtol=3e-3), "mismatch vs reference (N=200)"

    print("KERNEL_OK")
</pallas_src>

<mosaic_0001>
module attributes {stable_mosaic.version = 11 : i64} {
  func.func @_stl_kernel(%arg0: i32, %arg1: memref<16x64xbf16, #tpu.memory_space<vmem>>, %arg2: memref<64x128xbf16, #tpu.memory_space<vmem>>, %arg3: memref<128x256xbf16, #tpu.memory_space<vmem>>, %arg4: memref<16x128xf32, #tpu.memory_space<vmem>>) attributes {dimension_semantics = [#tpu.dimension_semantics<parallel>], iteration_bounds = array<i64: 1>, scalar_prefetch = 0 : i64, scratch_operands = 0 : i64, tpu.core_type = #tpu.core_type<tc>, window_params = [{transform_indices = @transform_0, window_bounds = array<i64: 16, 64>}, {pipeline_mode = #tpu.pipeline_mode<synchronous>, transform_indices = @transform_1, window_bounds = array<i64: 64, 128>}, {pipeline_mode = #tpu.pipeline_mode<synchronous>, transform_indices = @transform_2, window_bounds = array<i64: 128, 256>}, {transform_indices = @transform_3, window_bounds = array<i64: 16, 128>}]} {
    %c0 = arith.constant 0 : index
    %c0_0 = arith.constant 0 : index
    %0 = vector.load %arg1[%c0, %c0_0] : memref<16x64xbf16, #tpu.memory_space<vmem>>, vector<16x64xbf16>
    %c0_1 = arith.constant 0 : index
    %c0_2 = arith.constant 0 : index
    %1 = vector.load %arg2[%c0_1, %c0_2] : memref<64x128xbf16, #tpu.memory_space<vmem>>, vector<64x128xbf16>
    %cst = arith.constant dense<0.000000e+00> : vector<16x128xf32>
    %2 = tpu.matmul %0, %1, %cst {dimension_numbers = #tpu.dot_dimension_numbers<[1], [0], [0], [1], [0, 0, 1, 1], [], []>} : vector<16x64xbf16>, vector<64x128xbf16>, vector<16x128xf32> -> vector<16x128xf32>
    %cst_3 = arith.constant dense<0xFF800000> : vector<16xf32>
    %3 = vector.multi_reduction <maximumf>, %2, %cst_3 [1] : vector<16x128xf32> to vector<16xf32>
    %4 = vector.shape_cast %3 : vector<16xf32> to vector<16x1xf32>
    %5 = vector.broadcast %4 : vector<16x1xf32> to vector<16x128xf32>
    %6 = arith.subf %2, %5 : vector<16x128xf32>
    %7 = math.exp %6 : vector<16x128xf32>
    %8 = arith.truncf %7 : vector<16x128xf32> to vector<16x128xbf16>
    %c0_4 = arith.constant 0 : index
    %c0_5 = arith.constant 0 : index
    %9 = vector.load %arg3[%c0_4, %c0_5] : memref<128x256xbf16, #tpu.memory_space<vmem>>, vector<128x256xbf16>
    %cst_6 = arith.constant dense<0.000000e+00> : vector<16x256xf32>
    %10 = tpu.matmul %8, %9, %cst_6 {dimension_numbers = #tpu.dot_dimension_numbers<[1], [0], [0], [1], [0, 0, 1, 1], [], []>} : vector<16x128xbf16>, vector<128x256xbf16>, vector<16x256xf32> -> vector<16x256xf32>
    %11 = vector.extract_strided_slice %10 {offsets = [0, 0], sizes = [16, 128], strides = [1, 1]} : vector<16x256xf32> to vector<16x128xf32>
    %12 = vector.extract_strided_slice %10 {offsets = [0, 128], sizes = [16, 128], strides = [1, 1]} : vector<16x256xf32> to vector<16x128xf32>
    %cst_7 = arith.constant 1.17549435E-38 : f32
    %13 = vector.broadcast %cst_7 : f32 to vector<16x128xf32>
    %14 = arith.maximumf %12, %13 : vector<16x128xf32>
    %15 = tpu.reciprocal %14 {approx = true} : vector<16x128xf32> -> vector<16x128xf32>
    %16 = arith.mulf %14, %15 : vector<16x128xf32>
    %cst_8 = arith.constant 2.000000e+00 : f32
    %17 = vector.broadcast %cst_8 : f32 to vector<16x128xf32>
    %18 = arith.subf %17, %16 : vector<16x128xf32>
    %19 = arith.mulf %15, %18 : vector<16x128xf32>
    %20 = arith.mulf %11, %19 : vector<16x128xf32>
    %c0_9 = arith.constant 0 : index
    %c0_10 = arith.constant 0 : index
    %21 = vector.load %arg4[%c0_9, %c0_10] : memref<16x128xf32, #tpu.memory_space<vmem>>, vector<16x128xf32>
    tpu.vector_store %arg4[%c0_9, %c0_10], %20 {strides = array<i32>} : memref<16x128xf32, #tpu.memory_space<vmem>>, vector<16x128xf32>,
    return
  }
  func.func @transform_0(%arg0: i32) -> (i32, i32) {
    %c0_i32 = arith.constant 0 : i32
    %c0_i32_0 = arith.constant 0 : i32
    return %arg0, %c0_i32 : i32, i32
  }
  func.func @transform_1(%arg0: i32) -> (i32, i32) {
    %c0_i32 = arith.constant 0 : i32
    %c0_i32_0 = arith.constant 0 : i32
    %c0_i32_1 = arith.constant 0 : i32
    return %c0_i32, %c0_i32_0 : i32, i32
  }
  func.func @transform_2(%arg0: i32) -> (i32, i32) {
    %c0_i32 = arith.constant 0 : i32
    %c0_i32_0 = arith.constant 0 : i32
    %c0_i32_1 = arith.constant 0 : i32
    return %c0_i32, %c0_i32_0 : i32, i32
  }
  func.func @transform_3(%arg0: i32) -> (i32, i32) {
    %c0_i32 = arith.constant 0 : i32
    %c0_i32_0 = arith.constant 0 : i32
    return %arg0, %c0_i32 : i32, i32
  }
}

</mosaic_0001>

<bundles_post_ra>
// kernel: tpu_custom_call.1
= control target key start
LH: loop header
LB: loop body
LE: loop exit
PB: predicated region body
PF: predicated region fallthrough
CT: control target
= control target key end

     0   :  { %8 = vsyncpa [#allocation3], 0  ;;  %s596_s0 = inlined_call_operand.hbm [shape: bf16[16,64], index: 0, kind: input, shape index: {}]   ;;  %s597_s1 = inlined_call_operand.hbm [shape: bf16[64,128], index: 1, kind: input, shape index: {}]   ;;  %s598_s2 = inlined_call_operand.hbm [shape: bf16[128,256], index: 2, kind: input, shape index: {}]   ;;  %s599_s3 = inlined_call_operand.hbm [shape: f32[16,128], index: 3, kind: output, shape index: {}]  }
   0x1   :  { %9 = vsyncpa [#allocation6], 0 }
   0x2   :  { %10 = vsyncpa [#allocation4], 0  ;;  %s504_s12 = smov [#allocation5]   ;;  %s505_s14 = smov [#allocation2]  }
   0x3   :  { %s28_s13 = sshll.u32 %s504_s12, 4  ;;  %s16_s15 = sshll.u32 %s505_s14, 4  ;;  %s29_s13 = int_to_ptr.vmem [resolvable:$true] %s28_s13  ;;  %s535_s15 = int_to_ptr.vmem [resolvable:$true] %s16_s15 }
   0x4   :  { %s410_s18 = scalar_lea.hbm %s597_s1, 512 }
   0x5   :  { %p411_p0 = scmp.ne.s32.totalorder %s597_s1, %s410_s18  ;;  %p414_p1 = scmp.lt.u32.totalorder %s410_s18, %s597_s1 }
   0x7   :  { %p416_p2 = pnand %p414_p1, %p411_p0 }
   0x9   :  { %419 = shalt.err (!%p416_p2)
}
   0xa   :  { %s420_s23 = scalar_lea.vmem %s29_s13, 512  ;;  %p425_p4 = scmp.lt.s32.totalorder %s29_s13, %s29_s13 }
   0xb   :  { %p421_p3 = scmp.ne.s32.totalorder %s29_s13, %s420_s23  ;;  %p426_p5 = scmp.lt.s32.totalorder %s420_s23, %s420_s23 }
   0xd   :  { %p427_p6 = por %p426_p5, %p425_p4 }
   0xf   :  { %p428_p7 = pnand %p427_p6, %p421_p3 }
  0x11   :  { %431 = shalt.err (!%p428_p7)
}
  0x12   :  { %s506_s24 = smov 64   ;;  %s507_s25 = smov 4  }
  0x13   :  { %34 = dma.hbm_to_vmem [thread:$0]  %s597_s1, 512, %s29_s13, [#allocation6], %s506_s24, %s506_s24, %s507_s25  }
  0x14   :  { %s432_s30 = scalar_lea.hbm %s596_s0, 128 }
  0x15   :  { %p433_p8 = scmp.ne.s32.totalorder %s596_s0, %s432_s30  ;;  %p436_p9 = scmp.lt.u32.totalorder %s432_s30, %s596_s0 }
  0x17   :  { %p438_p10 = pnand %p436_p9, %p433_p8 }
  0x19   :  { %441 = shalt.err (!%p438_p10)
}
  0x1a   :  { %s442_s8 = scalar_lea.vmem %s535_s15, 128  ;;  %p447_p12 = scmp.lt.s32.totalorder %s535_s15, %s535_s15 }
  0x1b   :  { %p443_p11 = scmp.ne.s32.totalorder %s535_s15, %s442_s8  ;;  %p448_p13 = scmp.lt.s32.totalorder %s442_s8, %s442_s8 }
  0x1d   :  { %p449_p0 = por %p448_p13, %p447_p12 }
  0x1f   :  { %p450_p1 = pnand %p449_p0, %p443_p11 }
  0x21   :  { %453 = shalt.err (!%p450_p1)
}
  0x22   :  { %22 = dma.hbm_to_vmem [thread:$0]  %s596_s0, 128, %s535_s15, [#allocation3], %s506_s24, %s506_s24, %s507_s25  }
  0x23   :  { %s508_s10 = smov [#allocation7]   ;;  %s454_s14 = scalar_lea.hbm %s598_s2, 2048 }
  0x24   :  { %s40_s11 = sshll.u32 %s508_s10, 4  ;;  %p455_p2 = scmp.ne.s32.totalorder %s598_s2, %s454_s14  ;;  %s41_s11 = int_to_ptr.vmem [resolvable:$true] %s40_s11 }
  0x25   :  { %p458_p3 = scmp.lt.u32.totalorder %s454_s14, %s598_s2 }
  0x27   :  { %p460_p4 = pnand %p458_p3, %p455_p2 }
  0x29   :  { %463 = shalt.err (!%p460_p4)
}
  0x2a   :  { %s464_s20 = scalar_lea.vmem %s41_s11, 2048  ;;  %p469_p6 = scmp.lt.s32.totalorder %s41_s11, %s41_s11 }
  0x2b   :  { %p465_p5 = scmp.ne.s32.totalorder %s41_s11, %s464_s20  ;;  %p470_p7 = scmp.lt.s32.totalorder %s464_s20, %s464_s20 }
  0x2d   :  { %p471_p8 = por %p470_p7, %p469_p6 }
  0x2f   :  { %p472_p9 = pnand %p471_p8, %p465_p5 }
  0x31   :  { %475 = shalt.err (!%p472_p9)
}
  0x32   :  { %s509_s0 = smov 128   ;;  %s510_s15 = smov 8  }
  0x33   :  { %46 = dma.hbm_to_vmem [thread:$0]  %s598_s2, 2048, %s41_s11, [#allocation6], %s509_s0, %s509_s0, %s510_s15  }
  0x34   :  { %498 = dma.done.wait [#allocation3], 128  }
  0x35   :  { %499 = vsyncadd [#allocation3], 4294967168 }
  0x36   :  { %500 = dma.done.wait [#allocation6], 2560  }
  0x37   :  { %501 = vsyncadd [#allocation6], 4294964736  ;;  %v511_v0 = vmov 0.0   ;;  %vm512_vm0 = vmmov 0   ;;  %v373_v1 = vld [vmem:[#allocation5] sm:$0xff]   ;;  %v374_v2 = vld [vmem:[#allocation5 + $0x8] sm:$0xff]  }
  0x38   :  { %350 = vmatprep.subr.bf16.mxu0 %v511_v0  ;;  %358 = vmatprep.mubr.msk.bf16.mxu0 %vm512_vm0, %v511_v0  ;;  %v375_v3 = vld [vmem:[#allocation5 + $0x10] sm:$0xff]   ;;  %v376_v4 = vld [vmem:[#allocation5 + $0x18] sm:$0xff]   ;;  %vm96_vm1 = vcmask 523264   ;;  %v378_v6 = vld [vmem:[#allocation7 + $0x4] ss:$8 sps:$4 sm:$0xff]   ;;  %v513_v24 = vmov 0  }
  0x39   :  { %351 = vmatpush3.bf16.msra.mxu0 %v373_v1  ;;  %v377_v5 = vld [vmem:[#allocation2] sm:$0xff]   ;;  %v380_v7 = vld [vmem:[#allocation7] ss:$8 sps:$4 sm:$0xff]   ;;  %248 = vmatprep.subr.bf16.mxu1 %v378_v6  ;;  %v384_v10 = vld [vmem:[#allocation7 + $0x24] ss:$8 sps:$4 sm:$0xff]   ;;  %s514_s2 = smov [#allocation8]  }
  0x3a   :  { %352 = vmatprep.subr.bf16.mxu0 %v511_v0  ;;  %v381_v8 = vld [vmem:[#allocation7 + $0x14] ss:$8 sps:$4 sm:$0xff]   ;;  %249 = vmatpush1.bf16.msra.mxu1 %v380_v7  ;;  %v383_v9 = vld [vmem:[#allocation7 + $0x10] ss:$8 sps:$4 sm:$0xff]   ;;  %v386_v11 = vld [vmem:[#allocation7 + $0x20] ss:$8 sps:$4 sm:$0xff]  }
  0x3b   :  { %250 = vmatprep.subr.bf16.mxu1 %v381_v8  ;;  %v387_v16 = vld [vmem:[#allocation7 + $0x34] ss:$8 sps:$4 sm:$0xff]   ;;  %v389_v17 = vld [vmem:[#allocation7 + $0x30] ss:$8 sps:$4 sm:$0xff]   ;;  %v390_v18 = vld [vmem:[#allocation7 + $0x44] ss:$8 sps:$4 sm:$0xff]   ;;  %280 = vmatprep.mubr.bf16.mxu1 %v513_v24 }
  0x3c   :  { %v392_v19 = vld [vmem:[#allocation7 + $0x40] ss:$8 sps:$4 sm:$0xff]   ;;  %v393_v20 = vld [vmem:[#allocation7 + $0x54] ss:$8 sps:$4 sm:$0xff]   ;;  %v395_v21 = vld [vmem:[#allocation7 + $0x50] ss:$8 sps:$4 sm:$0xff]  }
  0x3d   :  { %353 = vmatpush3.bf16.msra.mxu0 %v374_v2  ;;  %v396_v22 = vld [vmem:[#allocation7 + $0x64] ss:$8 sps:$4 sm:$0xff]   ;;  %v398_v23 = vld [vmem:[#allocation7 + $0x60] ss:$8 sps:$4 sm:$0xff]   ;;  %v399_v25 = vld [vmem:[#allocation7 + $0x74] ss:$8 sps:$4 sm:$0xff]  }
  0x3e   :  { %354 = vmatprep.subr.bf16.mxu0 %v511_v0  ;;  %251 = vmatpush1.bf16.msra.mxu1 %v383_v9  ;;  %v401_v26 = vld [vmem:[#allocation7 + $0x70] ss:$8 sps:$4 sm:$0xff]   ;;  %s310_s23 = sshll.u32 %s514_s2, 4  ;;  %s311_s23 = int_to_ptr.vmem [resolvable:$true] %s310_s23 }
  0x3f   :  { %252 = vmatprep.subr.bf16.mxu1 %v384_v10  ;;  %s476_s24 = scalar_lea.vmem %s311_s23, 256  ;;  %p481_p11 = scmp.lt.s32.totalorder %s311_s23, %s311_s23 }
  0x40   :  { %p477_p10 = scmp.ne.s32.totalorder %s311_s23, %s476_s24  ;;  %p482_p12 = scmp.lt.s32.totalorder %s476_s24, %s476_s24 }
  0x41   :  { %355 = vmatpush3.bf16.msra.mxu0 %v375_v3 }
  0x42   :  { %356 = vmatprep.subr.bf16.mxu0 %v511_v0  ;;  %253 = vmatpush1.bf16.msra.mxu1 %v386_v11  ;;  %p483_p13 = por %p482_p12, %p481_p11 }
  0x43   :  { %254 = vmatprep.subr.bf16.mxu1 %v387_v16 }
  0x44   :  { %p484_p0 = pnand %p483_p13, %p477_p10 }
  0x45   :  { %357 = vmatpush3.bf16.msra.mxu0 %v376_v4 }
  0x46   :  { %255 = vmatpush1.bf16.msra.mxu1 %v389_v17 }
  0x47   :  { %256 = vmatprep.subr.bf16.mxu1 %v390_v18 }
  0x48   :  { %359 = vmatmul.mubr.msk.bf16.vlgmr.msra.gmra.mrb[0].mxu0 %vm96_vm1, %v377_v5 }
  0x4a   :  { %257 = vmatpush1.bf16.msra.mxu1 %v392_v19 }
  0x4b   :  { %258 = vmatprep.subr.bf16.mxu1 %v393_v20 }
  0x4e   :  { %259 = vmatpush1.bf16.msra.mxu1 %v395_v21 }
  0x4f   :  { %260 = vmatprep.subr.bf16.mxu1 %v396_v22 }
  0x52   :  { %261 = vmatpush1.bf16.msra.mxu1 %v398_v23 }
  0x53   :  { %262 = vmatprep.subr.bf16.mxu1 %v399_v25 }
  0x56   :  { %263 = vmatpush1.bf16.msra.mxu1 %v401_v26 }
 0x11b   :  { %v134_v12 = vpop.f32.mrb[0].mxu0 }
 0x11c   :  { %141 = vmax.xlane.f32.xlu0 %v134_v12  ;;  %v360_v13 = vpop.f32.mrb[1].mxu0 }
 0x11d   :  { %v137_v14 = vpop.f32.mrb[2].mxu0 }
 0x11e   :  { %v361_v15 = vpop.f32.mrb[3].mxu0 }
 0x120   :  { %143 = vmax.xlane.f32.xlu0 %v137_v14 }
 0x1a9   :  { %v142_v27 = vpop.xlane.xlu0 %141 }
 0x1aa   :  { %v145_v28 = vsub.f32 %v134_v12, %v142_v27 }
 0x1ac   :  { %v147_v29 = vmul.f32 1.442695, %v145_v28 }
 0x1ad   :  { %v144_v30 = vpop.xlane.xlu0 %143 }
 0x1ae   :  { %v146_v31 = vsub.f32 %v137_v14, %v144_v30  ;;  %402 = vpow2.f32 %v147_v29 }
 0x1b0   :  { %v149_v32 = vmul.f32 1.442695, %v146_v31 }
 0x1b2   :  { %404 = vpow2.f32 %v149_v32 }
 0x1b8   :  { %v403_v33 = vpop.eup %402 }
 0x1bc   :  { %v405_v34 = vpop.eup %404 }
 0x1bd   :  { %v151_v35 = vpack.c.bf16 %v405_v34, %v403_v33 }
 0x1bf   :  { %281 = vmatmul.mubr.bf16.vlgmr.msra.gmra.mrb[0].mxu1 %v151_v35 }
 0x292   :  { %v282_v36 = vpop.f32.mrb[0].mxu1 }
 0x293   :  { %v284_v37 = vpop.f32.mrb[1].mxu1 }
 0x294   :  { %v291_v38 = vmax.f32 %v284_v37, 1.1754944e-38  ;;  %v286_v39 = vpop.f32.mrb[2].mxu1 }
 0x295   :  { %v288_v40 = vpop.f32.mrb[3].mxu1 }
 0x296   :  { %406 = vrcp.f32 %v291_v38  ;;  %v292_v41 = vmax.f32 %v288_v40, 1.1754944e-38 }
 0x298   :  { %408 = vrcp.f32 %v292_v41 }
 0x2a0   :  { %v407_v42 = vpop.eup %406 }
 0x2a1   :  { %v295_v43 = vmul.f32 %v407_v42, %v291_v38 }
 0x2a2   :  { %v409_v44 = vpop.eup %408 }
 0x2a3   :  { %v297_v45 = vsub.f32 2.0, %v295_v43  ;;  %v296_v46 = vmul.f32 %v409_v44, %v292_v41 }
 0x2a5   :  { %v299_v47 = vmul.f32 %v407_v42, %v297_v45  ;;  %v298_v48 = vsub.f32 2.0, %v296_v46 }
 0x2a7   :  { %v300_v49 = vmul.f32 %v409_v44, %v298_v48  ;;  %v301_v50 = vmul.f32 %v299_v47, %v282_v36 }
 0x2a9   :  { %v302_v51 = vmul.f32 %v300_v49, %v286_v39  ;;  %303 = vst [vmem:[#allocation8] sm:$0xff] %v301_v50 }
 0x2ab   :  { %304 = vst [vmem:[#allocation8 + $0x8] sm:$0xff] %v302_v51 }
 0x2ac   :  { %487 = shalt.err (!%p484_p0)
}
 0x2ad   :  { %s488_s27 = scalar_lea.hbm %s599_s3, 256 }
 0x2ae   :  { %p489_p1 = scmp.ne.s32.totalorder %s599_s3, %s488_s27  ;;  %p492_p2 = scmp.lt.u32.totalorder %s488_s27, %s599_s3 }
 0x2b0   :  { %p494_p3 = pnand %p492_p2, %p489_p1 }
 0x2b2   :  { %497 = shalt.err (!%p494_p3)
}
 0x2b3   :  { %316 = dma.vmem_to_hbm [thread:$0]  %s311_s23, 256, %s599_s3, [#allocation4], %s509_s0, %s509_s0, %s510_s15  }
 0x2b4   :  { %502 = dma.done.wait [#allocation4], 256  }
 0x2b5   :  { %503 = vsyncadd [#allocation4], 4294967040 }
 0x2b6   :  { %320 = vsyncpa [#allocation3], 1 }
 0x2b7   :  { %321 = vsyncpa [#allocation6], 1 }
 0x2b8   :  { %322 = vsyncpa [#allocation4], 1 }

</bundles_post_ra>
